<compile_context>
chip_gen: v6e
topology: v6e:2x2x1
jax: 0.10.0
libtpu: 0.0.40
codegen_flags: <defaults>
</compile_context>

<pallas_src>
import jax
import jax.numpy as jnp
from jax.experimental import pallas as pl
from jax.experimental.pallas import tpu as pltpu


def linear_kernel(x_ref, w_ref, b_ref, o_ref):
    # x: (B, K), w: (K, N) (already (K, N) — transposed once at init), b: (1, N)
    # K is tiny (2), so skip the MXU and do the contraction on the VPU as
    # broadcast FMAs: y = sum_k x[:, k:k+1] * w[k:k+1, :] + b.
    x = x_ref[...]
    w = w_ref[...]
    y = b_ref[...]  # (1, N) broadcasts over the batch rows
    k_dim = x_ref.shape[1]
    for k in range(k_dim):  # static, unrolled at trace time (K = 2)
        y = y + x[:, k:k + 1] * w[k:k + 1, :]
    o_ref[...] = y.astype(o_ref.dtype)


def linear_pallas(x, w_t, b_row):
    """y = x @ W^T + b (torch.nn.Linear convention).

    Expects the weight already transposed to (in_features, out_features) and the
    bias already reshaped to (1, out_features) — both static, prepared once.
    """
    B = x.shape[0]
    OUT = w_t.shape[1]

    return pl.pallas_call(
        linear_kernel,
        out_shape=jax.ShapeDtypeStruct((B, OUT), x.dtype),
        in_specs=[
            pl.BlockSpec(memory_space=pltpu.MemorySpace.VMEM),  # x   (B, K)
            pl.BlockSpec(memory_space=pltpu.MemorySpace.VMEM),  # w_t (K, N)
            pl.BlockSpec(memory_space=pltpu.MemorySpace.VMEM),  # b   (1, N)
        ],
        out_specs=pl.BlockSpec(memory_space=pltpu.MemorySpace.VMEM),
    )(x, w_t, b_row)


class Model:
    """JAX/Pallas port of the reference torch module."""

    def __init__(self, key):
        in_f, out_f = 2, 3
        k_w, k_b = jax.random.split(key)
        bound = 1.0 / (in_f ** 0.5)
        # Deterministic init mirroring nn.Linear's uniform(-1/sqrt(in), 1/sqrt(in)).
        self.weight = jax.random.uniform(
            k_w, (out_f, in_f), dtype=jnp.float32, minval=-bound, maxval=bound)
        self.bias = jax.random.uniform(
            k_b, (out_f,), dtype=jnp.float32, minval=-bound, maxval=bound)
        # Static layout prep, done once (not per call): (K, N) weight, (1, N) bias.
        self.weight_t = jnp.asarray(self.weight.T)          # (2, 3)
        self.bias_row = jnp.asarray(self.bias.reshape(1, -1))  # (1, 3)

    def __call__(self, x):
        # First (and only shape-valid) application of the shared Linear layer.
        y = linear_pallas(x, self.weight_t, self.bias_row)
        # TODO(synk): Sequential's second `self.layers(y)` is shape-invalid in
        #             the original PyTorch module and is intentionally not emulated.
        return y


if __name__ == "__main__":
    key = jax.random.PRNGKey(0)
    k_model, k_x = jax.random.split(key)
    model = Model(k_model)
    x = jax.random.normal(k_x, (2, 2), dtype=jnp.float32)

    out = model(x)
    jax.block_until_ready(out)

    # Cross-check against plain-JAX reference of the same addmm.
    ref = x @ model.weight.T + model.bias
    assert out.shape == (2, 3)
    assert jnp.allclose(out, ref, atol=1e-5, rtol=1e-5)

    print("KERNEL_OK")
</pallas_src>

<mosaic_0001>
module attributes {stable_mosaic.version = 11 : i64} {
  func.func @linear_kernel(%arg0: memref<2x2xf32, #tpu.memory_space<vmem>>, %arg1: memref<2x3xf32, #tpu.memory_space<vmem>>, %arg2: memref<1x3xf32, #tpu.memory_space<vmem>>, %arg3: memref<2x3xf32, #tpu.memory_space<vmem>>) attributes {dimension_semantics = [], scalar_prefetch = 0 : i64, scratch_operands = 0 : i64, tpu.core_type = #tpu.core_type<tc>} {
    %c0 = arith.constant 0 : index
    %c0_0 = arith.constant 0 : index
    %0 = vector.load %arg0[%c0, %c0_0] : memref<2x2xf32, #tpu.memory_space<vmem>>, vector<2x2xf32>
    %c0_1 = arith.constant 0 : index
    %c0_2 = arith.constant 0 : index
    %1 = vector.load %arg1[%c0_1, %c0_2] : memref<2x3xf32, #tpu.memory_space<vmem>>, vector<2x3xf32>
    %c0_3 = arith.constant 0 : index
    %c0_4 = arith.constant 0 : index
    %2 = vector.load %arg2[%c0_3, %c0_4] : memref<1x3xf32, #tpu.memory_space<vmem>>, vector<1x3xf32>
    %3 = vector.extract_strided_slice %0 {offsets = [0, 0], sizes = [2, 1], strides = [1, 1]} : vector<2x2xf32> to vector<2x1xf32>
    %4 = vector.extract_strided_slice %1 {offsets = [0, 0], sizes = [1, 3], strides = [1, 1]} : vector<2x3xf32> to vector<1x3xf32>
    %5 = vector.broadcast %3 : vector<2x1xf32> to vector<2x3xf32>
    %6 = vector.broadcast %4 : vector<1x3xf32> to vector<2x3xf32>
    %7 = arith.mulf %5, %6 : vector<2x3xf32>
    %8 = vector.broadcast %2 : vector<1x3xf32> to vector<2x3xf32>
    %9 = arith.addf %8, %7 : vector<2x3xf32>
    %10 = vector.extract_strided_slice %0 {offsets = [0, 1], sizes = [2, 1], strides = [1, 1]} : vector<2x2xf32> to vector<2x1xf32>
    %11 = vector.extract_strided_slice %1 {offsets = [1, 0], sizes = [1, 3], strides = [1, 1]} : vector<2x3xf32> to vector<1x3xf32>
    %12 = vector.broadcast %10 : vector<2x1xf32> to vector<2x3xf32>
    %13 = vector.broadcast %11 : vector<1x3xf32> to vector<2x3xf32>
    %14 = arith.mulf %12, %13 : vector<2x3xf32>
    %15 = arith.addf %9, %14 : vector<2x3xf32>
    %c0_5 = arith.constant 0 : index
    %c0_6 = arith.constant 0 : index
    %16 = vector.load %arg3[%c0_5, %c0_6] : memref<2x3xf32, #tpu.memory_space<vmem>>, vector<2x3xf32>
    tpu.vector_store %arg3[%c0_5, %c0_6], %15 {strides = array<i32>} : memref<2x3xf32, #tpu.memory_space<vmem>>, vector<2x3xf32>,
    return
  }
}

</mosaic_0001>

<bundles_post_ra>
// kernel: tpu_custom_call.1
= control target key start
LH: loop header
LB: loop body
LE: loop exit
PB: predicated region body
PF: predicated region fallthrough
CT: control target
= control target key end

     0   :  { %8 = vsyncpa [#allocation3], 0  ;;  %s198_s0 = inlined_call_operand.hbm [shape: f32[2,2], index: 0, kind: input, shape index: {}]   ;;  %s199_s1 = inlined_call_operand.hbm [shape: f32[2,3], index: 1, kind: input, shape index: {}]   ;;  %s200_s2 = inlined_call_operand.vmem [shape: f32[1,3], index: 2, kind: input, shape index: {}]   ;;  %s201_s3 = inlined_call_operand.hbm [shape: f32[2,3], index: 3, kind: output, shape index: {}]  }
   0x1   :  { %9 = vsyncpa [#allocation6], 0 }
   0x2   :  { %10 = vsyncpa [#allocation4], 0  ;;  %s161_s12 = smov [#allocation2]   ;;  %s162_s14 = smov [#allocation5]  }
   0x3   :  { %s17_s13 = sshll.u32 %s161_s12, 4  ;;  %s27_s15 = sshll.u32 %s162_s14, 4  ;;  %s18_s13 = int_to_ptr.vmem [resolvable:$true] %s17_s13  ;;  %s28_s15 = int_to_ptr.vmem [resolvable:$true] %s27_s15 }
   0x4   :  { %s103_s16 = scalar_lea.vmem %s18_s13, 32  ;;  %p108_p1 = scmp.lt.s32.totalorder %s18_s13, %s18_s13 }
   0x5   :  { %p104_p0 = scmp.ne.s32.totalorder %s18_s13, %s103_s16  ;;  %p109_p2 = scmp.lt.s32.totalorder %s103_s16, %s103_s16 }
   0x7   :  { %p110_p3 = por %p109_p2, %p108_p1 }
   0x9   :  { %p111_p4 = pnand %p110_p3, %p104_p0 }
   0xb   :  { %114 = shalt.err (!%p111_p4)
}
   0xc   :  { %20 = dma.hbm_to_vmem [thread:$0]  %s198_s0, 32, %s18_s13, [#allocation3]  }
   0xd   :  { %s123_s19 = scalar_lea.vmem %s28_s15, 32  ;;  %p128_p6 = scmp.lt.s32.totalorder %s28_s15, %s28_s15 }
   0xe   :  { %p124_p5 = scmp.ne.s32.totalorder %s28_s15, %s123_s19  ;;  %p129_p7 = scmp.lt.s32.totalorder %s123_s19, %s123_s19 }
  0x10   :  { %p130_p8 = por %p129_p7, %p128_p6 }
  0x12   :  { %p131_p9 = pnand %p130_p8, %p124_p5 }
  0x14   :  { %134 = shalt.err (!%p131_p9)
}
  0x15   :  { %30 = dma.hbm_to_vmem [thread:$0]  %s199_s1, 32, %s28_s15, [#allocation6]  }
  0x16   :  { %155 = dma.done.wait [#allocation3], 32  }
  0x17   :  { %156 = vsyncadd [#allocation3], 4294967264 }
  0x18   :  { %157 = dma.done.wait [#allocation6], 32  }
  0x19   :  { %158 = vsyncadd [#allocation6], 4294967264  ;;  %v163_v0 = vmov 0   ;;  %v39_v1 = vld [vmem:[#allocation2] sm:$0x3]  ;;  %v164_v2 = vmov 1   ;;  %v47_v3 = vlaneseq }
  0x1a   :  { %93 = vset.pattern.permute.xlu0 %v163_v0  ;;  %v40_v6 = vld [vmem:[#allocation5] sm:$0x3]  ;;  %v87_v12 = vld [vmem:[%s200_s2] ss:$0 sm:$0xff]  ;;  %s165_s22 = smov [#allocation7]   ;;  %vm69_vm0 = vcmask 17408  }
  0x1b   :  { %44 = vperm.xlu0 %93, %v39_v1   ;;  %v48_v4 = vshrl.u32 %v47_v3, 7  ;;  %s77_s23 = sshll.u32 %s165_s22, 4  ;;  %s78_s23 = int_to_ptr.vmem [resolvable:$true] %s77_s23 }
  0x1c   :  { %s135_s24 = scalar_lea.vmem %s78_s23, 32  ;;  %p140_p11 = scmp.lt.s32.totalorder %s78_s23, %s78_s23 }
  0x1d   :  { %v49_v5 = vsub.s32 0, %v48_v4  ;;  %v65_v8 = vsub.s32 1, %v48_v4  ;;  %p136_p10 = scmp.ne.s32.totalorder %s78_s23, %s135_s24  ;;  %p141_p12 = scmp.lt.s32.totalorder %s135_s24, %s135_s24 }
  0x1f   :  { %94 = vset.pattern.permute.xlu0 %v164_v2  ;;  %v50_v7 = vrot.slane %v40_v6, %v49_v5  ;;  %v66_v11 = vrot.slane %v40_v6, %v65_v8  ;;  %p142_p13 = por %p141_p12, %p140_p11 }
  0x20   :  { %60 = vperm.xlu0 %94, %v39_v1  }
  0x21   :  { %p143_p0 = pnand %p142_p13, %p136_p10 }
  0x96   :  { %v45_v9 = vpop.permute.xlu0 %44 }
  0x97   :  { %v51_v10 = vmul.f32 %v50_v7, %v45_v9 }
  0x99   :  { %v58_v14 = vadd.f32 %v87_v12, %v51_v10 }
  0x9b   :  { %v61_v13 = vpop.permute.xlu0 %60 }
  0x9c   :  { %v67_v15 = vmul.f32 %v66_v11, %v61_v13 }
  0x9e   :  { %v68_v16 = vadd.f32 %v67_v15, %v58_v14 }
  0xa0   :  { %70 = vst.msk [vmem:[#allocation7] sm:$0x3] %vm69_vm0, %v68_v16 }
  0xa1   :  { %146 = shalt.err (!%p143_p0)
}
  0xa2   :  { %80 = dma.vmem_to_hbm [thread:$0]  %s78_s23, 32, %s201_s3, [#allocation4]  }
  0xa3   :  { %159 = dma.done.wait [#allocation4], 32  }
  0xa4   :  { %160 = vsyncadd [#allocation4], 4294967264 }
  0xa5   :  { %84 = vsyncpa [#allocation3], 1 }
  0xa6   :  { %85 = vsyncpa [#allocation6], 1 }
  0xa7   :  { %86 = vsyncpa [#allocation4], 1 }

</bundles_post_ra>
